<compile_context>
chip_gen: v5e
topology: v5e:2x2
jax: 0.10.0
libtpu: 0.0.40
codegen_flags: <defaults>
</compile_context>

<pallas_src>
import functools

import numpy as np

import jax
import jax.numpy as jnp
from jax.experimental import pallas as pl
from jax.experimental.pallas import tpu as pltpu


def _round_up(x: int, m: int) -> int:
    return (x + m - 1) // m * m


def _cdiv(a: int, b: int) -> int:
    return -(-a // b)


def _build_fused_dft(window_size, n_fft, hop, C, F, F_pad, dtype):
    """Window-folded onesided DFT basis, [C*hop, 2*F_pad] = [win*cos | 0 | -win*sin | 0]."""
    CH = C * hop
    n = np.arange(window_size, dtype=np.float64)
    win = 0.5 - 0.5 * np.cos(2.0 * np.pi * n / window_size)      # periodic hann (torch default)
    left = (n_fft - window_size) // 2                            # torch centers win_length < n_fft
    win_full = np.zeros(CH, dtype=np.float64)
    win_full[left:left + window_size] = win                      # zero outside window / beyond n_fft
    j = np.arange(CH, dtype=np.int64)
    f = np.arange(F, dtype=np.int64)
    phase = (j[:, None] * f[None, :]) % n_fft                    # exact integer phase (accuracy)
    ang = (2.0 * np.pi / n_fft) * phase.astype(np.float64)
    dft = np.zeros((CH, 2 * F_pad), dtype=np.float64)
    dft[:, :F] = win_full[:, None] * np.cos(ang)
    dft[:, F_pad:F_pad + F] = -win_full[:, None] * np.sin(ang)   # minus sign of imag baked in
    return jnp.asarray(dft, dtype=dtype)


def stft_feature_extraction_v1(
    raw_audio,
    length,
    *,
    window_size,
    window_shift,
    center=True,
    magnitude=True,
    n_fft=None,
    compute_dtype=jnp.float32,       # bfloat16 = fast path (f32 accumulation on MXU)
    frames_per_block=1024,
):
    """Pallas implementation of StftFeatureExtractionV1.forward.

    raw_audio: [B, T] float; length: [B] int (samples)
    returns (features [B, T'', F'], length' [B])
    """
    if n_fft is None:
        n_fft = window_size
    n_fft = int(n_fft)
    hop = int(window_shift)
    window_size = int(window_size)
    assert 1 <= window_size <= n_fft and hop >= 1

    B, _ = raw_audio.shape
    audio = raw_audio.astype(jnp.float32)

    if center:
        pad = n_fft // 2
        audio = jnp.pad(audio, ((0, 0), (pad, pad)))             # module uses pad_mode='constant'
    T_pad = audio.shape[1]
    assert T_pad >= n_fft, "audio shorter than n_fft (torch.stft would raise)"
    n_frames = (T_pad - n_fft) // hop + 1

    C = _cdiv(n_fft, hop)                    # hop-rows spanned by one frame
    F = n_fft // 2 + 1
    F_pad = _round_up(F, 128)                # lane-aligned re/im halves of the matmul output
    CH = C * hop                             # fused contraction depth

    # tail rows needed from the next block by the last frames of a block
    extra8 = _round_up(max(C - 1, 1), 8)

    # frame-row tile; multiple of extra8 so the tail block index is exact
    tm = _round_up(min(frames_per_block, _round_up(n_frames, extra8)), extra8)
    # ensure enough grid steps so v7x's 2 TensorCores both get pipelined work
    min_steps = 8
    if B * _cdiv(n_frames, tm) < min_steps:
        tm = max(extra8, _round_up(_cdiv(n_frames, _cdiv(min_steps, B)), extra8))
    n_blocks = _cdiv(n_frames, tm)
    n_frames_pad = n_blocks * tm

    # hop-chunked audio [B, R, hop]; pad so every block (incl. the tail block) is in-bounds
    R = n_frames_pad + extra8
    target = R * hop
    if T_pad < target:
        audio = jnp.pad(audio, ((0, 0), (0, target - T_pad)))
    elif T_pad > target:
        audio = audio[:, :target]            # samples unused by any valid frame
    audio = audio.reshape(B, R, hop).astype(compute_dtype)

    dft = _build_fused_dft(window_size, n_fft, hop, C, F, F_pad, compute_dtype)

    # ---- kernels ------------------------------------------------------------------
    def _fused_dot(dft_ref, cur_ref, nxt_ref, lhs_ref):
        # Pack the C hop-phases into one [tm, C*hop] LHS, then a single K=C*hop matmul.
        lhs_ref[:, 0:hop] = cur_ref[...]
        for c in range(1, C):                # static unroll, C is small (3-4 typically)
            cs = c * hop
            ce = cs + hop
            if c < tm:
                lhs_ref[0:tm - c, cs:ce] = cur_ref[c:tm, :]
                lhs_ref[tm - c:tm, cs:ce] = nxt_ref[0:c, :]
            else:                            # degenerate tiny-tile case
                lhs_ref[:, cs:ce] = nxt_ref[c - tm:c, :]
        return jnp.dot(lhs_ref[...], dft_ref[...],
                       preferred_element_type=jnp.float32)       # [tm, 2*F_pad] = [re | im]

    def mag_kernel(dft_ref, cur_ref, nxt_ref, out_ref, lhs_ref):
        acc = _fused_dot(dft_ref, cur_ref, nxt_ref, lhs_ref)
        re = acc[:, :F]
        im = acc[:, F_pad:F_pad + F]
        out_ref[...] = jnp.sqrt(re * re + im * im)

    def cplx_kernel(dft_ref, cur_ref, nxt_ref, re_ref, im_ref, lhs_ref):
        acc = _fused_dot(dft_ref, cur_ref, nxt_ref, lhs_ref)
        re_ref[...] = acc[:, :F]
        im_ref[...] = acc[:, F_pad:F_pad + F]

    # ---- pallas_call wiring ---------------------------------------------------------
    grid = (B, n_blocks)
    tail_stride = tm // extra8
    in_specs = [
        pl.BlockSpec((CH, 2 * F_pad), lambda b, i: (0, 0)),                      # constant DFT
        pl.BlockSpec((None, tm, hop), lambda b, i: (b, i, 0)),                   # current rows
        pl.BlockSpec((None, extra8, hop),
                     lambda b, i: (b, (i + 1) * tail_stride, 0)),                # overlap tail
    ]
    out_block = pl.BlockSpec((None, tm, F), lambda b, i: (b, i, 0))              # exact output
    scratch = [pltpu.VMEM((tm, CH), compute_dtype)]
    cparams = pltpu.CompilerParams(dimension_semantics=("parallel", "parallel"))

    if magnitude:
        feats = pl.pallas_call(
            mag_kernel,
            out_shape=jax.ShapeDtypeStruct((B, n_frames, F), jnp.float32),
            grid=grid,
            in_specs=in_specs,
            out_specs=out_block,
            scratch_shapes=scratch,
            compiler_params=cparams,
        )(dft, audio, audio)
    else:
        re, im = pl.pallas_call(
            cplx_kernel,
            out_shape=(
                jax.ShapeDtypeStruct((B, n_frames, F), jnp.float32),
                jax.ShapeDtypeStruct((B, n_frames, F), jnp.float32),
            ),
            grid=grid,
            in_specs=in_specs,
            out_specs=(out_block, out_block),
            scratch_shapes=scratch,
            compiler_params=cparams,
        )(dft, audio, audio)
        # interleave only the exact-size slabs (no padded / cropped passes)
        feats = jax.lax.complex(re, im)

    if center:
        out_length = length // window_shift + 1
    else:
        # torch.stft would raise for utterances shorter than n_fft; clamp instead.
        out_length = jnp.maximum(length - n_fft, 0) // window_shift + 1

    return feats, out_length


# ------------------------------------ main ------------------------------------------


if __name__ == "__main__":
    B, T = 2, 256
    window_size = 64
    window_shift = 16

    key = jax.random.PRNGKey(0)
    raw_audio = jax.random.normal(key, (B, T), dtype=jnp.float32)
    length = jnp.array([T, T - 56], dtype=jnp.int32)

    # pure-jnp reference (constant padding, matching the module's pad_mode='constant')
    n_fft = window_size
    nwin = jnp.arange(window_size, dtype=jnp.float32)
    win_ref = 0.5 - 0.5 * jnp.cos(2.0 * jnp.pi * nwin / window_size)
    padded = jnp.pad(raw_audio, ((0, 0), (n_fft // 2, n_fft // 2)))
    n_frames = (padded.shape[1] - n_fft) // window_shift + 1
    starts = jnp.arange(n_frames) * window_shift
    idx = starts[:, None] + jnp.arange(n_fft)[None, :]
    frames_ref = padded[:, idx] * win_ref[None, None, :]
    spec_ref = jnp.fft.rfft(frames_ref, axis=-1)          # [B, T'', F]
    mag_ref = jnp.abs(spec_ref)

    def run(magnitude, dtype):
        fn = jax.jit(
            functools.partial(
                stft_feature_extraction_v1,
                window_size=window_size,
                window_shift=window_shift,
                center=True,
                magnitude=magnitude,
                compute_dtype=dtype,
            )
        )
        return fn(raw_audio, length)

    feats_f32, out_len = run(True, jnp.float32)     # accurate default path
    feats_bf16, _ = run(True, jnp.bfloat16)         # fast path (bf16 inputs, f32 accum)
    cplx_f32, _ = run(False, jnp.float32)           # complex (magnitude=False) path
    jax.block_until_ready((feats_f32, feats_bf16, cplx_f32, out_len))

    F = n_fft // 2 + 1
    assert feats_f32.shape == (B, n_frames, F), feats_f32.shape
    assert feats_bf16.shape == (B, n_frames, F), feats_bf16.shape
    assert cplx_f32.shape == (B, n_frames, F), cplx_f32.shape
    assert out_len.shape == (B,)
    assert bool(jnp.all(out_len == length // window_shift + 1))

    assert bool(jnp.allclose(feats_f32, mag_ref, rtol=2e-2, atol=5e-2)), "f32 magnitude mismatch"
    assert bool(jnp.allclose(cplx_f32, spec_ref, rtol=2e-2, atol=5e-2)), "f32 complex mismatch"
    assert bool(jnp.allclose(feats_bf16, mag_ref, rtol=5e-2, atol=1e-1)), "bf16 magnitude mismatch"

    print("KERNEL_OK")
</pallas_src>

<mosaic_0001>
module attributes {stable_mosaic.version = 11 : i64} {
  func.func @mag_kernel(%arg0: i32, %arg1: i32, %arg2: memref<64x256xf32, #tpu.memory_space<vmem>>, %arg3: memref<1x8x16xf32, #tpu.memory_space<vmem>>, %arg4: memref<1x8x16xf32, #tpu.memory_space<vmem>>, %arg5: memref<1x8x33xf32, #tpu.memory_space<vmem>>, %arg6: memref<8x64xf32, #tpu.memory_space<vmem>>) attributes {dimension_semantics = [#tpu.dimension_semantics<parallel>, #tpu.dimension_semantics<parallel>], iteration_bounds = array<i64: 2, 3>, scalar_prefetch = 0 : i64, scratch_operands = 1 : i64, tpu.core_type = #tpu.core_type<tc>, window_params = [{pipeline_mode = #tpu.pipeline_mode<synchronous>, transform_indices = @transform_0, window_bounds = array<i64: 64, 256>}, {transform_indices = @transform_1, window_bounds = array<i64: 1, 8, 16>}, {transform_indices = @transform_2, window_bounds = array<i64: 1, 8, 16>}, {transform_indices = @transform_3, window_bounds = array<i64: 1, 8, 33>}]} {
    %c0 = arith.constant 0 : index
    %c0_0 = arith.constant 0 : index
    %c0_1 = arith.constant 0 : index
    %0 = vector.load %arg3[%c0, %c0_0, %c0_1] : memref<1x8x16xf32, #tpu.memory_space<vmem>>, vector<1x8x16xf32>
    %1 = vector.shape_cast %0 : vector<1x8x16xf32> to vector<8x16xf32>
    %c0_2 = arith.constant 0 : index
    %c0_3 = arith.constant 0 : index
    %2 = vector.load %arg6[%c0_2, %c0_3] : memref<8x64xf32, #tpu.memory_space<vmem>>, vector<8x16xf32>
    tpu.vector_store %arg6[%c0_2, %c0_3], %1 {strides = array<i32>} : memref<8x64xf32, #tpu.memory_space<vmem>>, vector<8x16xf32>,
    %c0_4 = arith.constant 0 : index
    %c1 = arith.constant 1 : index
    %c0_5 = arith.constant 0 : index
    %3 = vector.load %arg3[%c0_4, %c1, %c0_5] : memref<1x8x16xf32, #tpu.memory_space<vmem>>, vector<1x7x16xf32>
    %4 = vector.shape_cast %3 : vector<1x7x16xf32> to vector<7x16xf32>
    %c0_6 = arith.constant 0 : index
    %c16 = arith.constant 16 : index
    %5 = vector.load %arg6[%c0_6, %c16] : memref<8x64xf32, #tpu.memory_space<vmem>>, vector<7x16xf32>
    tpu.vector_store %arg6[%c0_6, %c16], %4 {strides = array<i32>} : memref<8x64xf32, #tpu.memory_space<vmem>>, vector<7x16xf32>,
    %c0_7 = arith.constant 0 : index
    %c0_8 = arith.constant 0 : index
    %c0_9 = arith.constant 0 : index
    %6 = vector.load %arg4[%c0_7, %c0_8, %c0_9] : memref<1x8x16xf32, #tpu.memory_space<vmem>>, vector<1x1x16xf32>
    %7 = vector.shape_cast %6 : vector<1x1x16xf32> to vector<1x16xf32>
    %c7 = arith.constant 7 : index
    %c16_10 = arith.constant 16 : index
    %8 = vector.load %arg6[%c7, %c16_10] : memref<8x64xf32, #tpu.memory_space<vmem>>, vector<1x16xf32>
    tpu.vector_store %arg6[%c7, %c16_10], %7 {strides = array<i32>} : memref<8x64xf32, #tpu.memory_space<vmem>>, vector<1x16xf32>,
    %c0_11 = arith.constant 0 : index
    %c2 = arith.constant 2 : index
    %c0_12 = arith.constant 0 : index
    %9 = vector.load %arg3[%c0_11, %c2, %c0_12] : memref<1x8x16xf32, #tpu.memory_space<vmem>>, vector<1x6x16xf32>
    %10 = vector.shape_cast %9 : vector<1x6x16xf32> to vector<6x16xf32>
    %c0_13 = arith.constant 0 : index
    %c32 = arith.constant 32 : index
    %11 = vector.load %arg6[%c0_13, %c32] : memref<8x64xf32, #tpu.memory_space<vmem>>, vector<6x16xf32>
    tpu.vector_store %arg6[%c0_13, %c32], %10 {strides = array<i32>} : memref<8x64xf32, #tpu.memory_space<vmem>>, vector<6x16xf32>,
    %c0_14 = arith.constant 0 : index
    %c0_15 = arith.constant 0 : index
    %c0_16 = arith.constant 0 : index
    %12 = vector.load %arg4[%c0_14, %c0_15, %c0_16] : memref<1x8x16xf32, #tpu.memory_space<vmem>>, vector<1x2x16xf32>
    %13 = vector.shape_cast %12 : vector<1x2x16xf32> to vector<2x16xf32>
    %c6 = arith.constant 6 : index
    %c32_17 = arith.constant 32 : index
    %14 = vector.load %arg6[%c6, %c32_17] : memref<8x64xf32, #tpu.memory_space<vmem>>, vector<2x16xf32>
    tpu.vector_store %arg6[%c6, %c32_17], %13 {strides = array<i32>} : memref<8x64xf32, #tpu.memory_space<vmem>>, vector<2x16xf32>,
    %c0_18 = arith.constant 0 : index
    %c3 = arith.constant 3 : index
    %c0_19 = arith.constant 0 : index
    %15 = vector.load %arg3[%c0_18, %c3, %c0_19] : memref<1x8x16xf32, #tpu.memory_space<vmem>>, vector<1x5x16xf32>
    %16 = vector.shape_cast %15 : vector<1x5x16xf32> to vector<5x16xf32>
    %c0_20 = arith.constant 0 : index
    %c48 = arith.constant 48 : index
    %17 = vector.load %arg6[%c0_20, %c48] : memref<8x64xf32, #tpu.memory_space<vmem>>, vector<5x16xf32>
    tpu.vector_store %arg6[%c0_20, %c48], %16 {strides = array<i32>} : memref<8x64xf32, #tpu.memory_space<vmem>>, vector<5x16xf32>,
    %c0_21 = arith.constant 0 : index
    %c0_22 = arith.constant 0 : index
    %c0_23 = arith.constant 0 : index
    %18 = vector.load %arg4[%c0_21, %c0_22, %c0_23] : memref<1x8x16xf32, #tpu.memory_space<vmem>>, vector<1x3x16xf32>
    %19 = vector.shape_cast %18 : vector<1x3x16xf32> to vector<3x16xf32>
    %c5 = arith.constant 5 : index
    %c48_24 = arith.constant 48 : index
    %20 = vector.load %arg6[%c5, %c48_24] : memref<8x64xf32, #tpu.memory_space<vmem>>, vector<3x16xf32>
    tpu.vector_store %arg6[%c5, %c48_24], %19 {strides = array<i32>} : memref<8x64xf32, #tpu.memory_space<vmem>>, vector<3x16xf32>,
    %c0_25 = arith.constant 0 : index
    %c0_26 = arith.constant 0 : index
    %21 = vector.load %arg6[%c0_25, %c0_26] : memref<8x64xf32, #tpu.memory_space<vmem>>, vector<8x64xf32>
    %c0_27 = arith.constant 0 : index
    %c0_28 = arith.constant 0 : index
    %22 = vector.load %arg2[%c0_27, %c0_28] : memref<64x256xf32, #tpu.memory_space<vmem>>, vector<64x256xf32>
    %cst = arith.constant dense<0.000000e+00> : vector<8x256xf32>
    %23 = tpu.matmul %21, %22, %cst {dimension_numbers = #tpu.dot_dimension_numbers<[1], [0], [0], [1], [0, 0, 1, 1], [], []>} : vector<8x64xf32>, vector<64x256xf32>, vector<8x256xf32> -> vector<8x256xf32>
    %24 = vector.extract_strided_slice %23 {offsets = [0, 0], sizes = [8, 33], strides = [1, 1]} : vector<8x256xf32> to vector<8x33xf32>
    %25 = vector.extract_strided_slice %23 {offsets = [0, 128], sizes = [8, 33], strides = [1, 1]} : vector<8x256xf32> to vector<8x33xf32>
    %26 = arith.mulf %24, %24 : vector<8x33xf32>
    %27 = arith.mulf %25, %25 : vector<8x33xf32>
    %28 = arith.addf %26, %27 : vector<8x33xf32>
    %29 = math.sqrt %28 : vector<8x33xf32>
    %c0_29 = arith.constant 0 : index
    %c0_30 = arith.constant 0 : index
    %c0_31 = arith.constant 0 : index
    %30 = vector.load %arg5[%c0_29, %c0_30, %c0_31] : memref<1x8x33xf32, #tpu.memory_space<vmem>>, vector<1x8x33xf32>
    %31 = vector.shape_cast %30 : vector<1x8x33xf32> to vector<8x33xf32>
    %32 = vector.shape_cast %29 : vector<8x33xf32> to vector<1x8x33xf32>
    tpu.vector_store %arg5[%c0_29, %c0_30, %c0_31], %32 {strides = array<i32>} : memref<1x8x33xf32, #tpu.memory_space<vmem>>, vector<1x8x33xf32>,
    return
  }
  func.func @transform_0(%arg0: i32, %arg1: i32) -> (i32, i32) {
    %c0_i32 = arith.constant 0 : i32
    %c0_i32_0 = arith.constant 0 : i32
    %c0_i32_1 = arith.constant 0 : i32
    return %c0_i32, %c0_i32_0 : i32, i32
  }
  func.func @transform_1(%arg0: i32, %arg1: i32) -> (i32, i32, i32) {
    %c0_i32 = arith.constant 0 : i32
    %c0_i32_0 = arith.constant 0 : i32
    return %arg0, %arg1, %c0_i32 : i32, i32, i32
  }
  func.func @transform_2(%arg0: i32, %arg1: i32) -> (i32, i32, i32) {
    %c1_i32 = arith.constant 1 : i32
    %0 = arith.addi %arg1, %c1_i32 : i32
    %c1_i32_0 = arith.constant 1 : i32
    %1 = arith.muli %0, %c1_i32_0 : i32
    %c0_i32 = arith.constant 0 : i32
    %c0_i32_1 = arith.constant 0 : i32
    return %arg0, %1, %c0_i32 : i32, i32, i32
  }
  func.func @transform_3(%arg0: i32, %arg1: i32) -> (i32, i32, i32) {
    %c0_i32 = arith.constant 0 : i32
    %c0_i32_0 = arith.constant 0 : i32
    return %arg0, %arg1, %c0_i32 : i32, i32, i32
  }
}

</mosaic_0001>

<bundles_post_ra>
// kernel: stft_feature_extraction_v1.1
= control target key start
LH: loop header
LB: loop body
LE: loop exit
PB: predicated region body
PF: predicated region fallthrough
CT: control target
= control target key end

     0   :  { %8 = vsyncpa [#allocation4], 0  ;;  %s672_s12 = smov 0   ;;  %s674_s13 = smov 0   ;;  %s763_s0 = inlined_call_operand.hbm [shape: f32[64,256], index: 0, kind: input, shape index: {}]   ;;  %s764_s1 = inlined_call_operand.vmem [shape: f32[2,32,16], index: 1, kind: input, shape index: {}, may-alias: {1,2}]   ;;  %s765_s2 = inlined_call_operand.vmem [shape: f32[2,32,16], index: 2, kind: input, shape index: {}, may-alias: {1,2}]   ;;  %s766_s3 = inlined_call_operand.vmem [shape: f32[2,17,33], index: 3, kind: output, shape index: {}]  }
   0x1   :  { %s676_s14 = smov 0   ;;  %s678_s15 = smov 0  }
   0x2   :  { %s680_s16 = smov 0  }
   0x3 LB: > { %s497_s17 = sadd.s32 4294967295, %s644_s16   ;;  %s23_s18 = sadd.s32 1, %s636_s14  ;;  %s644_s16 = sphi %s680_s16, %s14_s16   ;;  %s640_s15 = sphi %s678_s15, %s772_s15   ;;  %s636_s14 = sphi %s676_s14, %s771_s14   ;;  %s632_s13 = sphi %s674_s13, %s770_s13   ;;  %s628_s12 = sphi %s672_s12, %s769_s12  }
   0x4   : > { %p24_p0 = scmp.ge.s32.totalorder %s23_s18, 3  ;;  %s26_s19 = sadd.s32 1, %s640_s15 }
   0x5   : > { %p499_p1 = scmp.ge.s32.totalorder %s644_s16, 1  ;;  %p138_p2 = scmp.lt.s32.totalorder %s644_s16, 7 }
   0x6   : > { %s774_s18 = smov (%p24_p0, %s23_s18), 0  ;;  %s776_s19 = smov (!%p24_p0, %s26_s19), %s640_s15 }
   0x7   : > { %p705_p3 = pnand %p499_p1, %p138_p2  ;;  %p28_p4 = scmp.ge.s32.totalorder %s776_s19, 2 }
   0x8   : > { %p709_p5 = scmp.eq.s32.totalorder %s497_s17, 0  ;;  %s149_s24 = sshll.u32 %s763_s0, 4  ;;  %s150_s24 = int_to_ptr.hbm [resolvable:$true] %s149_s24 }
   0x9   : > { %p518_p6 = pneg %p705_p3  ;;  %s778_s19 = smov (%p28_p4, %s776_s19), 0 }
   0xa   : > { %s646_s25 = smov [#allocation3]   ;;  %s647_s27 = smov 256  }
   0xb   : > { %s151_s26 = sshll.u32 %s646_s25, 4  ;;  %p519_p7 = pnand %p709_p5, %p518_p6  ;;  %s152_s26 = int_to_ptr.vmem [resolvable:$true] %s151_s26 }
   0xc   : > { %s648_s28 = smov 16   ;;  %191 = sbr.rel (%p705_p3) target bundleno = 313 (0x139), region = 32 }
   0xd   : > { %521 = dma.hbm_to_vmem [thread:$0]  (!%p519_p7), %s150_s24, 2048, %s152_s26, [#allocation4], %s647_s27, %s647_s27, %s648_s28  }
  0x11   : > { %623 = dma.done.wait (%p709_p5), [#allocation4], 2048  }
  0x12   : > { %625 = vsyncadd (%p709_p5), [#allocation4], 4294965248  ;;  %p231_p8 = scmp.lt.s32.totalorder %s632_s13, 1  ;;  %p233_p9 = scmp.lt.s32.totalorder %s628_s12, 3  ;;  %vm258_vm0 = vcmask 130048   ;;  %v317_v7 = vld [vmem:[#allocation3 + $0x70] sm:$0xff] }
  0x13   : > { %s239_s6 = sadd.s32 1, %s628_s12  ;;  %s649_s10 = smov 16   ;;  %v318_v8 = vld [vmem:[#allocation3 + $0x78] sm:$0xff]  ;;  %v315_v9 = vld [vmem:[#allocation3 + $0x60] sm:$0xff]  ;;  %331 = vmatpush.msra.mxu0 %v317_v7  ;;  %v316_v10 = vld [vmem:[#allocation3 + $0x68] sm:$0xff]  ;;  %vm265_vm1 = vcmask 260224  }
  0x14   : > { %s780_s13 = smov (!%p231_p8, %s632_s13), 1  ;;  %p242_p10 = scmp.lt.s32.totalorder %s239_s6, 3  ;;  %351 = vmatpush.msra.mxu1 %v318_v8  ;;  %v313_v11 = vld [vmem:[#allocation3 + $0x50] sm:$0xff]  ;;  %v314_v12 = vld [vmem:[#allocation3 + $0x58] sm:$0xff]  ;;  %v311_v13 = vld [vmem:[#allocation3 + $0x40] sm:$0xff]  ;;  %vm279_vm2 = vcmask 390400  }
  0x15   : > { %s234_s29 = scalar_select %p233_p9, %s628_s12, 3  ;;  %332 = vmatpush.msra.mxu0 %v315_v9  ;;  %v312_v14 = vld [vmem:[#allocation3 + $0x48] sm:$0xff]  ;;  %v309_v15 = vld [vmem:[#allocation3 + $0x30] sm:$0xff]  ;;  %v310_v16 = vld [vmem:[#allocation3 + $0x38] sm:$0xff]  ;;  %vm293_vm3 = vcmask 520576   ;;  %vm272_vm4 = vcmask 254080  }
  0x16   : > { %s504_s30 = sshll.u32 %s780_s13, 2  ;;  %s650_s11 = smov 32   ;;  %352 = vmatpush.msra.mxu1 %v316_v10  ;;  %v307_v17 = vld [vmem:[#allocation3 + $0x20] sm:$0xff]  ;;  %v308_v18 = vld [vmem:[#allocation3 + $0x28] sm:$0xff]  ;;  %v305_v19 = vld [vmem:[#allocation3 + $0x10] sm:$0xff]  ;;  %vm286_vm5 = vcmask 386304  }
  0x17   : > { %s236_s4 = sadd.s32 %s504_s30, %s234_s29  ;;  %s782_s6 = smov (!%p242_p10, %s239_s6), 3  ;;  %333 = vmatpush.msra.mxu0 %v313_v11  ;;  %v306_v20 = vld [vmem:[#allocation3 + $0x18] sm:$0xff]  ;;  %v303_v21 = vld [vmem:[#allocation3] sm:$0xff]  ;;  %v304_v22 = vld [vmem:[#allocation3 + $0x8] sm:$0xff]  ;;  %vm300_vm6 = vcmask 518528   ;;  %vm319_vm7 = vcmask 523264  }
  0x18   : > { %s505_s5 = sshll.u32 %s236_s4, 3  ;;  %s245_s17 = sadd.s32 %s504_s30, %s782_s6  ;;  %353 = vmatpush.msra.mxu1 %v314_v12  ;;  %vm378_vm9 = vcmask 269312  }
  0x19   : > { %s238_s9 = scalar_lea.vmem %s764_s1, %s505_s5  ;;  %s651_s20 = smov 48   ;;  %334 = vmatpush.msra.mxu0 %v311_v13 }
  0x1a   : > { %v260_v0 = vld [vmem:[%s238_s9 + $0x1] sm:$0x7f]  ;;  %s507_s21 = sshll.u32 %s245_s17, 3  ;;  %354 = vmatpush.msra.mxu1 %v312_v14  ;;  %p251_p11 = scmp.lt.s32.totalorder %s628_s12, 2 }
  0x1b   : > { %v257_v1 = vld [vmem:[%s238_s9] sm:$0xff]  ;;  %262 = vrot.lane.b32.xlu0 %v260_v0, %s649_s10  ;;  %s247_s24 = scalar_lea.vmem %s765_s2, %s507_s21  ;;  %335 = vmatpush.msra.mxu0 %v309_v15  ;;  %s513_s25 = smul.u32 3, %s780_s13 }
  0x1c   : > { %v274_v2 = vld [vmem:[%s238_s9 + $0x2] sm:$0x3f]  ;;  %259 = vst.msk [vmem:[#allocation2] sm:$0xff] %vm258_vm0, %v257_v1  ;;  %v267_v4 = vld [vmem:[%s247_s24] sm:$0x1]  ;;  %355 = vmatpush.msra.mxu1 %v310_v16  ;;  %s784_s12 = smov (!%p251_p11, %s628_s12), 2 }
  0x1d   : > { %276 = vrot.lane.b32.xlu1 %v274_v2, %s650_s11  ;;  %v288_v3 = vld [vmem:[%s238_s9 + $0x3] sm:$0x1f]  ;;  %v281_v5 = vld [vmem:[%s247_s24] sm:$0x3]  ;;  %336 = vmatpush.msra.mxu0 %v307_v17  ;;  %s254_s26 = sadd.s32 %s513_s25, %s784_s12 }
  0x1e   : > { %290 = vrot.lane.b32.xlu2 %v288_v3, %s651_s20  ;;  %v295_v6 = vld [vmem:[%s247_s24] sm:$0x7]  ;;  %356 = vmatpush.msra.mxu1 %v308_v18  ;;  %s508_s27 = sshll.u32 %s254_s26, 3 }
  0x1f   : > { %337 = vmatpush.msra.mxu0 %v305_v19  ;;  %s256_s30 = scalar_lea.vmem %s766_s3, %s508_s27 }
  0x20   : > { %357 = vmatpush.msra.mxu1 %v306_v20 }
  0x21   : > { %338 = vmatpush.msra.mxu0 %v303_v21 }
  0x22   : > { %358 = vmatpush.msra.mxu1 %v304_v22 }
  0x23   : > { %269 = vrot.lane.b32.xlu0 %v267_v4, %s649_s10 }
  0x25   : > { %283 = vrot.lane.b32.xlu1 %v281_v5, %s650_s11 }
  0x26   : > { %297 = vrot.lane.b32.xlu2 %v295_v6, %s651_s20 }
  0x78   : > { %v291_v23 = vpop.permute.xlu2 %290 }
  0x80   : > { %v298_v26 = vpop.permute.xlu2 %297 }
  0x8d   : > { %v263_v24 = vpop.permute.xlu0 %262 }
  0x8e   : > { %266 = vst.msk [vmem:[#allocation2] sm:$0x7f] %vm265_vm1, %v263_v24 }
  0x8f   : > { %v277_v25 = vpop.permute.xlu1 %276 }
  0x90   : > { %280 = vst.msk [vmem:[#allocation2] sm:$0x3f] %vm279_vm2, %v277_v25 }
  0x91   : > { %294 = vst.msk [vmem:[#allocation2] sm:$0x1f] %vm293_vm3, %v291_v23 }
  0x95   : > { %v270_v27 = vpop.permute.xlu0 %269 }
  0x96   : > { %273 = vst.msk [vmem:[#allocation2 + $0x7] sm:$0x1] %vm272_vm4, %v270_v27 }
  0x97   : > { %v284_v28 = vpop.permute.xlu1 %283 }
  0x98   : > { %287 = vst.msk [vmem:[#allocation2 + $0x6] sm:$0x3] %vm286_vm5, %v284_v28 }
  0x99   : > { %301 = vst.msk [vmem:[#allocation2 + $0x5] sm:$0x7] %vm300_vm6, %v298_v26 }
  0xa0   : > { %v302_v29 = vld [vmem:[#allocation2] sm:$0xff] }
  0xa1   : > { %509 = vmatmul.msk.f32.vlgmr.msra.gmra.mxu0 %vm319_vm7, %v302_v29  ;;  %510 = vmatmul.msk.f32.vlgmr.msra.gmra.mxu1 %vm319_vm7, %v302_v29 }
 0x11e   : > { %v340_v30 = vpop.f32.mrf.mxu0  ;;  %v360_v31 = vpop.f32.mrf.mxu1 }
 0x11f   : > { %v363_v32 = vmul.f32 %v340_v30, %v340_v30  ;;  %v364_v33 = vmul.f32 %v360_v31, %v360_v31 }
 0x121   : > { %v365_v34 = vadd.f32 %v364_v33, %v363_v32 }
 0x123   : > { %570 = vrsqrt.f32 %v365_v34  ;;  %vm373_vm8 = vcmp.eq.f32.partialorder %v365_v34, inf  ;;  %v376_v42 = vand.u32 2147483648, %v365_v34  ;;  %vm375_vm10 = vcmp.eq.f32.partialorder %v365_v34, 0.0 }
 0x129   : > { %v571_v35 = vpop.eup %570 }
 0x12a   : > { %v367_v36 = vmul.f32 %v571_v35, %v365_v34 }
 0x12c   : > { %v368_v37 = vmul.f32 %v571_v35, %v367_v36 }
 0x12e   : > { %v369_v38 = vmul.f32 0.5, %v368_v37 }
 0x130   : > { %v370_v39 = vsub.f32 1.5, %v369_v38 }
 0x132   : > { %v371_v40 = vmul.f32 %v571_v35, %v370_v39 }
 0x134   : > { %v372_v41 = vmul.f32 %v371_v40, %v365_v34 }
 0x136   : > { %v374_v43 = vsel %vm373_vm8, %v365_v34, %v372_v41 }
 0x137   : > { %v377_v44 = vsel %vm375_vm10, %v376_v42, %v374_v43 }
 0x138   : > { %379 = vst.msk [vmem:[%s256_s30] sm:$0xff] %vm378_vm9, %v377_v44 }
 0x139 PF: > { %s14_s16 = sadd.s32 1, %s644_s16   ;;  %s769_s12 = smov %s636_s14 }
 0x13a   : > { %p11_p12 = scmp.ge.s32.totalorder %s14_s16, 8   ;;  %s770_s13 = smov %s640_s15 }
 0x13b   : > { %s771_s14 = smov %s774_s18  ;;  %s772_s15 = smov %s778_s19 }
 0x13c   :  { %13 = sbr.rel (!%p11_p12) target bundleno = 3 (0x3), region = 70 }
 0x141   :  { %407 = vsyncpa [#allocation4], 1 }
 0x142   :  { %409 = vsyncpa [#allocation4 + $0x1], 1 }

</bundles_post_ra>
